<compile_context>
chip_gen: v5e
topology: v5e:2x2
jax: 0.10.0
libtpu: 0.0.40
codegen_flags: <defaults>
</compile_context>

<pallas_src>
import functools

import jax
import jax.numpy as jnp
from jax.experimental import pallas as pl
from jax.experimental.pallas import tpu as pltpu


def _round_up(n, m):
    return ((n + m - 1) // m) * m


def _mlp_kernel(x_ref, w1_ref, b1_ref, w2_ref, b2_ref, w3t_ref, b3_ref, o_ref,
                *, precision):
    # Linear(24 -> 128) + ReLU   (MXU)
    h1 = jnp.dot(x_ref[...], w1_ref[...],
                 preferred_element_type=jnp.float32, precision=precision)
    h1 = jnp.maximum(h1 + b1_ref[...], 0.0)
    # Linear(128 -> 64) + ReLU   (MXU)
    h2 = jnp.dot(h1, w2_ref[...],
                 preferred_element_type=jnp.float32, precision=precision)
    h2 = jnp.maximum(h2 + b2_ref[...], 0.0)
    # Linear(64 -> 1): VPU broadcast-multiply + XLU lane reduce (no N=1 matmul).
    dot3 = jnp.sum(h2 * w3t_ref[...], axis=-1, keepdims=True)        # (tb, 1)
    # Lane-dense output row: (tb,1) -> (1,tb) via XLU transpose (free slot),
    # bias add + sigmoid (EUP) on the dense row, unmasked store.
    row = dot3.T + b3_ref[0, 0]                                       # (1, tb)
    o_ref[0] = jax.nn.sigmoid(row)


@functools.partial(jax.jit, static_argnames=("block_batch", "precision"))
def baseline_model_forward(x, w1, b1, w2, b2, w3, b3, *,
                           block_batch=4096,
                           precision=jax.lax.Precision.HIGHEST):
    B, in_dim = x.shape
    out_dim = w3.shape[1]  # == 1

    # Batch tile: multiple of 8 (f32 sublane). Target >=2 grid steps so both
    # v7x TensorCores get work, capped at block_batch for the VMEM budget.
    tb = min(block_batch, max(8, _round_up(pl.cdiv(B, 2), 8)))
    num_blocks = pl.cdiv(B, tb)  # ragged last block handled by Pallas masking

    # w3 transposed to a (1, 64) row for the VPU/XLU final layer.
    w3t = w3.T

    weight_bytes = sum(int(a.size) * 4 for a in (w1, b1, w2, b2, w3t, b3))
    rows = num_blocks * tb
    cost = pl.CostEstimate(
        flops=2 * rows * (in_dim * 128 + 128 * 64 + 64),
        transcendentals=2 * rows,  # sigmoid = exp + reciprocal per row
        bytes_accessed=rows * (in_dim + 1) * 4 + weight_bytes,
    )

    vmem = pltpu.MemorySpace.VMEM
    smem = pltpu.MemorySpace.SMEM

    out = pl.pallas_call(
        functools.partial(_mlp_kernel, precision=precision),
        # Lane-dense output slab: one (1, tb) row per grid step.
        out_shape=jax.ShapeDtypeStruct((num_blocks, 1, tb), jnp.float32),
        grid_spec=pl.GridSpec(
            grid=(num_blocks,),
            in_specs=[
                # x: tiled along batch, streamed through the pipeline.
                pl.BlockSpec((tb, in_dim), lambda i: (i, 0), memory_space=vmem),
                # Weights / biases: constant block index -> resident in VMEM.
                pl.BlockSpec(w1.shape, lambda i: (0, 0), memory_space=vmem),
                pl.BlockSpec(b1.shape, lambda i: (0, 0), memory_space=vmem),
                pl.BlockSpec(w2.shape, lambda i: (0, 0), memory_space=vmem),
                pl.BlockSpec(b2.shape, lambda i: (0, 0), memory_space=vmem),
                pl.BlockSpec(w3t.shape, lambda i: (0, 0), memory_space=vmem),
                # Final bias (1,1): scalar in SMEM, no padded VMEM tile / DMA.
                pl.BlockSpec(memory_space=smem),
            ],
            out_specs=pl.BlockSpec((1, 1, tb), lambda i: (i, 0, 0),
                                   memory_space=vmem),
        ),
        compiler_params=pltpu.CompilerParams(
            dimension_semantics=("parallel",),
            vmem_limit_bytes=40 * 1024 * 1024,
        ),
        cost_estimate=cost,
    )(x, w1, b1, w2, b2, w3t, b3)

    # (num_blocks, 1, tb) flattens in batch order; drop ragged-tail rows.
    return out.reshape(rows, out_dim)[:B]


def init_params(key, input_dim=24):
    """Deterministic init mimicking PyTorch nn.Linear default (uniform +-1/sqrt(fan_in))."""
    dims = [(input_dim, 128), (128, 64), (64, 1)]
    params = []
    for i, (fan_in, fan_out) in enumerate(dims):
        kw, kb = jax.random.split(jax.random.fold_in(key, i))
        bound = 1.0 / (fan_in ** 0.5)
        w = jax.random.uniform(kw, (fan_in, fan_out), jnp.float32, -bound, bound)
        b = jax.random.uniform(kb, (1, fan_out), jnp.float32, -bound, bound)
        params += [w, b]
    return params


def reference_forward(x, w1, b1, w2, b2, w3, b3):
    hp = jax.lax.Precision.HIGHEST
    h1 = jnp.maximum(jnp.dot(x, w1, precision=hp) + b1, 0.0)
    h2 = jnp.maximum(jnp.dot(h1, w2, precision=hp) + b2, 0.0)
    return jax.nn.sigmoid(jnp.dot(h2, w3, precision=hp) + b3)


if __name__ == "__main__":
    key = jax.random.PRNGKey(0)
    k_x, k_p = jax.random.split(key)

    B, input_dim = 8, 24
    x = jax.random.normal(k_x, (B, input_dim), dtype=jnp.float32)
    w1, b1, w2, b2, w3, b3 = init_params(k_p, input_dim)

    out = jax.block_until_ready(baseline_model_forward(x, w1, b1, w2, b2, w3, b3))
    ref = reference_forward(x, w1, b1, w2, b2, w3, b3)
    assert out.shape == (B, 1)
    assert jnp.allclose(out, ref, atol=1e-5, rtol=1e-5)

    # Ragged multi-step grid (masked last block + lane-dense writeback).
    B2 = 1030
    x2 = jax.random.normal(jax.random.fold_in(key, 7), (B2, input_dim), jnp.float32)
    out2 = jax.block_until_ready(baseline_model_forward(x2, w1, b1, w2, b2, w3, b3))
    ref2 = reference_forward(x2, w1, b1, w2, b2, w3, b3)
    assert out2.shape == (B2, 1)
    assert jnp.allclose(out2, ref2, atol=1e-5, rtol=1e-5)

    # Large batch hitting the block_batch=4096 cap with a ragged tail.
    B3 = 9000
    x3 = jax.random.normal(jax.random.fold_in(key, 11), (B3, input_dim), jnp.float32)
    out3 = jax.block_until_ready(baseline_model_forward(x3, w1, b1, w2, b2, w3, b3))
    ref3 = reference_forward(x3, w1, b1, w2, b2, w3, b3)
    assert out3.shape == (B3, 1)
    assert jnp.allclose(out3, ref3, atol=1e-5, rtol=1e-5)

    print("KERNEL_OK")
</pallas_src>

<mosaic_0001>
module attributes {stable_mosaic.version = 11 : i64} {
  func.func @_mlp_kernel(%arg0: i32, %arg1: memref<8x24xf32, #tpu.memory_space<vmem>>, %arg2: memref<24x128xf32, #tpu.memory_space<vmem>>, %arg3: memref<1x128xf32, #tpu.memory_space<vmem>>, %arg4: memref<128x64xf32, #tpu.memory_space<vmem>>, %arg5: memref<1x64xf32, #tpu.memory_space<vmem>>, %arg6: memref<1x64xf32, #tpu.memory_space<vmem>>, %arg7: memref<1x1xf32, #tpu.memory_space<smem>>, %arg8: memref<1x1x8xf32, #tpu.memory_space<vmem>>) attributes {dimension_semantics = [#tpu.dimension_semantics<parallel>], iteration_bounds = array<i64: 1>, scalar_prefetch = 0 : i64, scratch_operands = 0 : i64, tpu.core_type = #tpu.core_type<tc>, window_params = [{transform_indices = @transform_0, window_bounds = array<i64: 8, 24>}, {pipeline_mode = #tpu.pipeline_mode<synchronous>, transform_indices = @transform_1, window_bounds = array<i64: 24, 128>}, {pipeline_mode = #tpu.pipeline_mode<synchronous>, transform_indices = @transform_2, window_bounds = array<i64: 1, 128>}, {pipeline_mode = #tpu.pipeline_mode<synchronous>, transform_indices = @transform_3, window_bounds = array<i64: 128, 64>}, {pipeline_mode = #tpu.pipeline_mode<synchronous>, transform_indices = @transform_4, window_bounds = array<i64: 1, 64>}, {pipeline_mode = #tpu.pipeline_mode<synchronous>, transform_indices = @transform_5, window_bounds = array<i64: 1, 64>}, {transform_indices = @transform_6, window_bounds = array<i64: 1, 1>}, {transform_indices = @transform_7, window_bounds = array<i64: 1, 1, 8>}]} {
    %c0 = arith.constant 0 : index
    %c0_0 = arith.constant 0 : index
    %0 = vector.load %arg1[%c0, %c0_0] : memref<8x24xf32, #tpu.memory_space<vmem>>, vector<8x24xf32>
    %c0_1 = arith.constant 0 : index
    %c0_2 = arith.constant 0 : index
    %1 = vector.load %arg2[%c0_1, %c0_2] : memref<24x128xf32, #tpu.memory_space<vmem>>, vector<24x128xf32>
    %cst = arith.constant dense<0.000000e+00> : vector<8x128xf32>
    %2 = tpu.matmul %0, %1, %cst {dimension_numbers = #tpu.dot_dimension_numbers<[1], [0], [0], [1], [0, 0, 1, 1], [], []>, precision = #tpu.contract_precision<fp32>} : vector<8x24xf32>, vector<24x128xf32>, vector<8x128xf32> -> vector<8x128xf32>
    %c0_3 = arith.constant 0 : index
    %c0_4 = arith.constant 0 : index
    %3 = vector.load %arg3[%c0_3, %c0_4] : memref<1x128xf32, #tpu.memory_space<vmem>>, vector<1x128xf32>
    %4 = vector.broadcast %3 : vector<1x128xf32> to vector<8x128xf32>
    %5 = arith.addf %2, %4 : vector<8x128xf32>
    %cst_5 = arith.constant 0.000000e+00 : f32
    %6 = vector.broadcast %cst_5 : f32 to vector<8x128xf32>
    %7 = arith.maximumf %5, %6 : vector<8x128xf32>
    %c0_6 = arith.constant 0 : index
    %c0_7 = arith.constant 0 : index
    %8 = vector.load %arg4[%c0_6, %c0_7] : memref<128x64xf32, #tpu.memory_space<vmem>>, vector<128x64xf32>
    %cst_8 = arith.constant dense<0.000000e+00> : vector<8x64xf32>
    %9 = tpu.matmul %7, %8, %cst_8 {dimension_numbers = #tpu.dot_dimension_numbers<[1], [0], [0], [1], [0, 0, 1, 1], [], []>, precision = #tpu.contract_precision<fp32>} : vector<8x128xf32>, vector<128x64xf32>, vector<8x64xf32> -> vector<8x64xf32>
    %c0_9 = arith.constant 0 : index
    %c0_10 = arith.constant 0 : index
    %10 = vector.load %arg5[%c0_9, %c0_10] : memref<1x64xf32, #tpu.memory_space<vmem>>, vector<1x64xf32>
    %11 = vector.broadcast %10 : vector<1x64xf32> to vector<8x64xf32>
    %12 = arith.addf %9, %11 : vector<8x64xf32>
    %cst_11 = arith.constant 0.000000e+00 : f32
    %13 = vector.broadcast %cst_11 : f32 to vector<8x64xf32>
    %14 = arith.maximumf %12, %13 : vector<8x64xf32>
    %c0_12 = arith.constant 0 : index
    %c0_13 = arith.constant 0 : index
    %15 = vector.load %arg6[%c0_12, %c0_13] : memref<1x64xf32, #tpu.memory_space<vmem>>, vector<1x64xf32>
    %16 = vector.broadcast %15 : vector<1x64xf32> to vector<8x64xf32>
    %17 = arith.mulf %14, %16 : vector<8x64xf32>
    %cst_14 = arith.constant dense<0.000000e+00> : vector<8xf32>
    %18 = vector.multi_reduction <add>, %17, %cst_14 [1] : vector<8x64xf32> to vector<8xf32>
    %19 = vector.shape_cast %18 : vector<8xf32> to vector<8x1xf32>
    %20 = tpu.transpose %19, [1, 0] : vector<8x1xf32> -> vector<1x8xf32>
    %c0_15 = arith.constant 0 : index
    %c0_16 = arith.constant 0 : index
    %21 = memref.load %arg7[%c0_15, %c0_16] : memref<1x1xf32, #tpu.memory_space<smem>>
    %22 = vector.broadcast %21 : f32 to vector<1x8xf32>
    %23 = arith.addf %20, %22 : vector<1x8xf32>
    %24 = arith.negf %23 : vector<1x8xf32>
    %25 = math.exp %24 : vector<1x8xf32>
    %cst_17 = arith.constant 1.000000e+00 : f32
    %26 = vector.broadcast %cst_17 : f32 to vector<1x8xf32>
    %27 = arith.addf %26, %25 : vector<1x8xf32>
    %28 = arith.divf %26, %27 : vector<1x8xf32>
    %c0_18 = arith.constant 0 : index
    %c0_19 = arith.constant 0 : index
    %c0_20 = arith.constant 0 : index
    %29 = vector.load %arg8[%c0_18, %c0_19, %c0_20] : memref<1x1x8xf32, #tpu.memory_space<vmem>>, vector<1x1x8xf32>
    %30 = vector.shape_cast %29 : vector<1x1x8xf32> to vector<1x8xf32>
    %31 = vector.shape_cast %28 : vector<1x8xf32> to vector<1x1x8xf32>
    tpu.vector_store %arg8[%c0_18, %c0_19, %c0_20], %31 {strides = array<i32>} : memref<1x1x8xf32, #tpu.memory_space<vmem>>, vector<1x1x8xf32>,
    return
  }
  func.func @transform_0(%arg0: i32) -> (i32, i32) {
    %c0_i32 = arith.constant 0 : i32
    %c0_i32_0 = arith.constant 0 : i32
    return %arg0, %c0_i32 : i32, i32
  }
  func.func @transform_1(%arg0: i32) -> (i32, i32) {
    %c0_i32 = arith.constant 0 : i32
    %c0_i32_0 = arith.constant 0 : i32
    %c0_i32_1 = arith.constant 0 : i32
    return %c0_i32, %c0_i32_0 : i32, i32
  }
  func.func @transform_2(%arg0: i32) -> (i32, i32) {
    %c0_i32 = arith.constant 0 : i32
    %c0_i32_0 = arith.constant 0 : i32
    %c0_i32_1 = arith.constant 0 : i32
    return %c0_i32, %c0_i32_0 : i32, i32
  }
  func.func @transform_3(%arg0: i32) -> (i32, i32) {
    %c0_i32 = arith.constant 0 : i32
    %c0_i32_0 = arith.constant 0 : i32
    %c0_i32_1 = arith.constant 0 : i32
    return %c0_i32, %c0_i32_0 : i32, i32
  }
  func.func @transform_4(%arg0: i32) -> (i32, i32) {
    %c0_i32 = arith.constant 0 : i32
    %c0_i32_0 = arith.constant 0 : i32
    %c0_i32_1 = arith.constant 0 : i32
    return %c0_i32, %c0_i32_0 : i32, i32
  }
  func.func @transform_5(%arg0: i32) -> (i32, i32) {
    %c0_i32 = arith.constant 0 : i32
    %c0_i32_0 = arith.constant 0 : i32
    %c0_i32_1 = arith.constant 0 : i32
    return %c0_i32, %c0_i32_0 : i32, i32
  }
  func.func @transform_6(%arg0: i32) -> (i32, i32) {
    %c0_i32 = arith.constant 0 : i32
    %c0_i32_0 = arith.constant 0 : i32
    %c0_i32_1 = arith.constant 0 : i32
    return %c0_i32, %c0_i32_0 : i32, i32
  }
  func.func @transform_7(%arg0: i32) -> (i32, i32, i32) {
    %c0_i32 = arith.constant 0 : i32
    %c0_i32_0 = arith.constant 0 : i32
    %c0_i32_1 = arith.constant 0 : i32
    return %arg0, %c0_i32, %c0_i32_0 : i32, i32, i32
  }
}

</mosaic_0001>

<bundles_post_ra>
// kernel: baseline_model_forward.1
= control target key start
LH: loop header
LB: loop body
LE: loop exit
PB: predicated region body
PF: predicated region fallthrough
CT: control target
= control target key end

     0   :  { %vm36_vm0 = vcmask 195584   ;;  %s1074_s0 = inlined_call_operand.vmem [shape: f32[8,24], index: 0, kind: input, shape index: {}]   ;;  %s1075_s1 = inlined_call_operand.vmem [shape: f32[24,128], index: 1, kind: input, shape index: {}]   ;;  %s1076_s2 = inlined_call_operand.vmem [shape: f32[1,128], index: 2, kind: input, shape index: {}]   ;;  %s1077_s3 = inlined_call_operand.vmem [shape: f32[128,64], index: 3, kind: input, shape index: {}]   ;;  %s1078_s4 = inlined_call_operand.vmem [shape: f32[1,64], index: 4, kind: input, shape index: {}]   ;;  %s1079_s5 = inlined_call_operand.vmem [shape: f32[1,64], index: 5, kind: input, shape index: {}]   ;;  %s1080_s6 = inlined_call_operand.<no memory space> [shape: f32[1,1], index: 6, kind: input, shape index: {}]   ;;  %s1081_s7 = inlined_call_operand.hbm [shape: f32[1,1,8], index: 7, kind: output, shape index: {}]  }
   0x1   :  { %v31_v0 = vld [vmem:[%s1075_s1 + $0x10] sm:$0xff]  ;;  %v30_v1 = vld [vmem:[%s1075_s1 + $0x8] sm:$0xff]  ;;  %v29_v2 = vld [vmem:[%s1075_s1] sm:$0xff] }
   0x2   :  { %v742_v3 = vand.u32 4294901760, %v31_v0  ;;  %v744_v4 = vand.u32 4294901760, %v30_v1  ;;  %v746_v5 = vand.u32 4294901760, %v29_v2  ;;  %v28_v6 = vld [vmem:[%s1074_s0] sm:$0xff]  ;;  %v228_v7 = vld [vmem:[%s1077_s3 + $0x78] sm:$0xff]  ;;  %v227_v8 = vld [vmem:[%s1077_s3 + $0x70] sm:$0xff] }
   0x3   :  { %v38_v9 = vsel %vm36_vm0, %v28_v6, 0  ;;  %v757_v10 = vand.u32 4294901760, %v228_v7  ;;  %v759_v11 = vand.u32 4294901760, %v227_v8  ;;  %v226_v12 = vld [vmem:[%s1077_s3 + $0x68] sm:$0xff]  ;;  %v225_v13 = vld [vmem:[%s1077_s3 + $0x60] sm:$0xff]  ;;  %v224_v34 = vld [vmem:[%s1077_s3 + $0x58] sm:$0xff] }
   0x4   :  { %54 = vmatpush.msra.mxu0 %v742_v3  ;;  %v769_v14 = vsub.f32 %v31_v0, %v742_v3  ;;  %v771_v15 = vand.u32 4294901760, %v38_v9  ;;  %v774_v16 = vsub.f32 %v30_v1, %v744_v4  ;;  %v777_v17 = vsub.f32 %v29_v2, %v746_v5  ;;  %v223_v39 = vld [vmem:[%s1077_s3 + $0x50] sm:$0xff]  ;;  %v222_v40 = vld [vmem:[%s1077_s3 + $0x48] sm:$0xff] }
   0x5   :  { %v780_v18 = vsub.f32 %v228_v7, %v757_v10  ;;  %v783_v19 = vsub.f32 %v227_v8, %v759_v11  ;;  %v785_v20 = vand.u32 4294901760, %v226_v12  ;;  %v787_v21 = vand.u32 4294901760, %v225_v13  ;;  %234 = vmatpush.msra.mxu2 %v757_v10 }
   0x6   :  { %56 = vmatpush.msra.mxu0 %v744_v4  ;;  %v83_v22 = vand.u32 4294901760, %v769_v14  ;;  %v793_v23 = vsub.f32 %v38_v9, %v771_v15  ;;  %v89_v24 = vand.u32 4294901760, %v774_v16  ;;  %v95_v25 = vand.u32 4294901760, %v777_v17 }
   0x7   :  { %v276_v26 = vand.u32 4294901760, %v780_v18  ;;  %v282_v27 = vand.u32 4294901760, %v783_v19  ;;  %v800_v28 = vsub.f32 %v226_v12, %v785_v20  ;;  %v803_v29 = vsub.f32 %v225_v13, %v787_v21  ;;  %236 = vmatpush.msra.mxu2 %v759_v11 }
   0x8   :  { %58 = vmatpush.msra.mxu0 %v746_v5  ;;  %v84_v30 = vsub.f32 %v769_v14, %v83_v22  ;;  %v61_v31 = vand.u32 4294901760, %v793_v23  ;;  %v90_v32 = vsub.f32 %v774_v16, %v89_v24  ;;  %v96_v33 = vsub.f32 %v777_v17, %v95_v25 }
   0x9   :  { %v277_v35 = vsub.f32 %v780_v18, %v276_v26  ;;  %v283_v36 = vsub.f32 %v783_v19, %v282_v27  ;;  %v288_v37 = vand.u32 4294901760, %v800_v28  ;;  %v294_v38 = vand.u32 4294901760, %v803_v29  ;;  %238 = vmatpush.msra.mxu2 %v785_v20 }
   0xa   :  { %119 = vmatpush.msrb.mxu0 %v769_v14 }
   0xb   :  { %13 = vsyncpa [#allocation4], 0  ;;  %v85_v41 = vand.u32 4294901760, %v84_v30  ;;  %v62_v42 = vsub.f32 %v793_v23, %v61_v31  ;;  %v91_v43 = vand.u32 4294901760, %v90_v32  ;;  %v97_v44 = vand.u32 4294901760, %v96_v33  ;;  %v221_v45 = vld [vmem:[%s1077_s3 + $0x40] sm:$0xff]  ;;  %240 = vmatpush.msra.mxu2 %v787_v21 }
   0xc   :  { %v220_v46 = vld [vmem:[%s1077_s3 + $0x38] sm:$0xff]  ;;  %122 = vmatpush.msrb.mxu0 %v774_v16  ;;  %v278_v47 = vand.u32 4294901760, %v277_v35  ;;  %v284_v48 = vand.u32 4294901760, %v283_v36  ;;  %v289_v49 = vsub.f32 %v800_v28, %v288_v37  ;;  %v295_v50 = vsub.f32 %v803_v29, %v294_v38  ;;  %v219_v51 = vld [vmem:[%s1077_s3 + $0x30] sm:$0xff]  ;;  %v218_v56 = vld [vmem:[%s1077_s3 + $0x28] sm:$0xff] }
   0xd   :  { %86 = vmatpush.msra.mxu1 %v85_v41  ;;  %v63_v52 = vand.u32 4294901760, %v62_v42  ;;  %v854_v53 = vand.u32 4294901760, %v224_v34  ;;  %v856_v54 = vand.u32 4294901760, %v223_v39  ;;  %v858_v55 = vand.u32 4294901760, %v222_v40  ;;  %v217_v0 = vld [vmem:[%s1077_s3 + $0x20] sm:$0xff] }
   0xe   :  { %125 = vmatpush.msrb.mxu0 %v777_v17  ;;  %279 = vmatpush.msra.mxu3 %v278_v47  ;;  %v290_v57 = vand.u32 4294901760, %v289_v49  ;;  %v864_v58 = vand.u32 4294901760, %v221_v45  ;;  %v866_v59 = vand.u32 4294901760, %v220_v46  ;;  %v877_v63 = vand.u32 4294901760, %v219_v51  ;;  %v215_v17 = vld [vmem:[%s1077_s3 + $0x10] sm:$0xff] }
   0xf   :  { %64 = vmatmul.f32.vlgmr.msra.gmra.mxu0 %v63_v52  ;;  %92 = vmatpush.msra.mxu1 %v91_v43  ;;  %v869_v60 = vsub.f32 %v224_v34, %v854_v53  ;;  %v872_v61 = vsub.f32 %v223_v39, %v856_v54  ;;  %v875_v62 = vsub.f32 %v222_v40, %v858_v55  ;;  %v888_v6 = vand.u32 4294901760, %v218_v56  ;;  %v216_v34 = vld [vmem:[%s1077_s3 + $0x18] sm:$0xff] }
  0x10   :  { %174 = vmatpush.msra.mxu0 %v83_v22  ;;  %285 = vmatpush.msra.mxu3 %v284_v48  ;;  %v883_v1 = vsub.f32 %v221_v45, %v864_v58  ;;  %v886_v2 = vsub.f32 %v220_v46, %v866_v59  ;;  %v296_v7 = vand.u32 4294901760, %v295_v50  ;;  %v899_v14 = vsub.f32 %v219_v51, %v877_v63 }
  0x11   :  { %98 = vmatpush.msra.mxu1 %v97_v44  ;;  %v300_v8 = vand.u32 4294901760, %v869_v60  ;;  %v306_v9 = vand.u32 4294901760, %v872_v61  ;;  %v312_v12 = vand.u32 4294901760, %v875_v62  ;;  %242 = vmatpush.msra.mxu2 %v854_v53  ;;  %v901_v22 = vand.u32 4294901760, %v217_v0 }
  0x12   :  { %100 = vmatmul.f32.vlgmr.msra.gmra.mxu1 %v771_v15  ;;  %178 = vmatpush.msra.mxu0 %v89_v24  ;;  %v318_v13 = vand.u32 4294901760, %v883_v1  ;;  %v324_v24 = vand.u32 4294901760, %v886_v2  ;;  %v918_v33 = vsub.f32 %v218_v56, %v888_v6  ;;  %v330_v39 = vand.u32 4294901760, %v899_v14 }
  0x13   :  { %146 = vmatpush.msrb.mxu1 %v742_v3  ;;  %291 = vmatpush.msra.mxu3 %v290_v57  ;;  %v301_v30 = vsub.f32 %v869_v60, %v300_v8  ;;  %v307_v32 = vsub.f32 %v872_v61, %v306_v9  ;;  %v313_v16 = vsub.f32 %v875_v62, %v312_v12  ;;  %v937_v41 = vand.u32 4294901760, %v216_v34 }
  0x14   :  { %182 = vmatpush.msra.mxu0 %v95_v25  ;;  %244 = vmatpush.msra.mxu2 %v856_v54  ;;  %v319_v36 = vsub.f32 %v883_v1, %v318_v13  ;;  %v933_v40 = vsub.f32 %v217_v0, %v901_v22  ;;  %v939_v42 = vand.u32 4294901760, %v215_v17  ;;  %v325_v44 = vsub.f32 %v886_v2, %v324_v24 }
  0x15   :  { %148 = vmatpush.msrb.mxu1 %v744_v4  ;;  %297 = vmatpush.msra.mxu3 %v296_v7  ;;  %v302_v25 = vand.u32 4294901760, %v301_v30  ;;  %v308_v35 = vand.u32 4294901760, %v307_v32  ;;  %v314_v43 = vand.u32 4294901760, %v313_v16  ;;  %v336_v45 = vand.u32 4294901760, %v918_v33  ;;  %v214_v30 = vld [vmem:[%s1077_s3 + $0x8] sm:$0xff]  ;;  %v213_v16 = vld [vmem:[%s1077_s3] sm:$0xff] }
  0x16   :  { %246 = vmatpush.msra.mxu2 %v858_v55  ;;  %v948_v46 = vsub.f32 %v216_v34, %v937_v41  ;;  %v331_v47 = vsub.f32 %v899_v14, %v330_v39  ;;  %v342_v48 = vand.u32 4294901760, %v933_v40  ;;  %v958_v49 = vsub.f32 %v215_v17, %v939_v42 }
  0x17   :  { %128 = vmatmul.f32.vlgmr.msrb.gmra.mxu0 %v793_v23  ;;  %150 = vmatpush.msrb.mxu1 %v746_v5  ;;  %v326_v50 = vand.u32 4294901760, %v325_v44  ;;  %v337_v23 = vsub.f32 %v918_v33, %v336_v45  ;;  %v261_v32 = vand.u32 4294901760, %v214_v30  ;;  %v263_v17 = vand.u32 4294901760, %v213_v16 }
  0x18   :  { %303 = vmatpush.msra.mxu3 %v302_v25  ;;  %248 = vmatpush.msra.mxu2 %v864_v58  ;;  %v332_v51 = vand.u32 4294901760, %v331_v47  ;;  %v354_v52 = vand.u32 4294901760, %v958_v49  ;;  %vm580_vm1 = vcmask 523264   ;;  %vm638_vm5 = vcmask 57344  }
  0x19   :  { %202 = vmatpush.msra.mxu1 %v742_v3  ;;  %377 = vmatpush.msrb.mxu0 %v780_v18  ;;  %v320_v3 = vand.u32 4294901760, %v319_v36  ;;  %v338_v56 = vand.u32 4294901760, %v337_v23  ;;  %v359_v34 = vsub.f32 %v214_v30, %v261_v32  ;;  %v659_v18 = vld [vmem:[%s1076_s2] ss:$0 sm:$0xff] }
  0x1a   :  { %154 = vmatmul.f32.vlgmr.msrb.gmra.mxu1 %v61_v31  ;;  %309 = vmatpush.msra.mxu3 %v308_v35  ;;  %v348_v31 = vand.u32 4294901760, %v948_v46  ;;  %v355_v0 = vsub.f32 %v958_v49, %v354_v52  ;;  %v365_v35 = vsub.f32 %v213_v16, %v263_v17 }
  0x1b   :  { %204 = vmatpush.msra.mxu1 %v744_v4  ;;  %250 = vmatpush.msra.mxu2 %v866_v59  ;;  %v343_v4 = vsub.f32 %v933_v40, %v342_v48  ;;  %v360_v25 = vand.u32 4294901760, %v359_v34 }
  0x1c   :  { %315 = vmatpush.msra.mxu3 %v314_v43  ;;  %380 = vmatpush.msrb.mxu0 %v783_v19  ;;  %v366_v43 = vand.u32 4294901760, %v365_v35 }
  0x1d   :  { %206 = vmatpush.msra.mxu1 %v746_v5  ;;  %252 = vmatpush.msra.mxu2 %v877_v63  ;;  %v349_v5 = vsub.f32 %v948_v46, %v348_v31  ;;  %v344_v57 = vand.u32 4294901760, %v343_v4  ;;  %v361_v36 = vsub.f32 %v359_v34, %v360_v25 }
  0x1e   :  { %321 = vmatpush.msra.mxu3 %v320_v3  ;;  %383 = vmatpush.msrb.mxu0 %v800_v28  ;;  %v367_v3 = vsub.f32 %v365_v35, %v366_v43 }
  0x1f   :  { %430 = vmatpush.msrb.mxu1 %v757_v10  ;;  %184 = vmatmul.f32.vlgmr.msra.gmra.mxu0 %v771_v15  ;;  %v350_v7 = vand.u32 4294901760, %v349_v5  ;;  %v362_v44 = vand.u32 4294901760, %v361_v36 }
  0x20   :  { %254 = vmatpush.msra.mxu2 %v888_v6  ;;  %327 = vmatpush.msra.mxu3 %v326_v50  ;;  %v368_v47 = vand.u32 4294901760, %v367_v3 }
  0x21   :  { %432 = vmatpush.msrb.mxu1 %v759_v11  ;;  %386 = vmatpush.msrb.mxu0 %v803_v29 }
  0x22   :  { %256 = vmatpush.msra.mxu2 %v901_v22  ;;  %208 = vmatmul.f32.vlgmr.msra.gmra.mxu1 %v771_v15  ;;  %v356_v15 = vand.u32 4294901760, %v355_v0 }
  0x23   :  { %333 = vmatpush.msra.mxu3 %v332_v51  ;;  %434 = vmatpush.msrb.mxu1 %v785_v20 }
  0x24   :  { %258 = vmatpush.msra.mxu2 %v937_v41  ;;  %389 = vmatpush.msrb.mxu0 %v869_v60 }
  0x25   :  { %339 = vmatpush.msra.mxu3 %v338_v56  ;;  %436 = vmatpush.msrb.mxu1 %v787_v21 }
  0x26   :  { %260 = vmatpush.msra.mxu2 %v939_v42  ;;  %392 = vmatpush.msrb.mxu0 %v872_v61 }
  0x27   :  { %345 = vmatpush.msra.mxu3 %v344_v57  ;;  %438 = vmatpush.msrb.mxu1 %v854_v53 }
  0x28   :  { %395 = vmatpush.msrb.mxu0 %v875_v62  ;;  %262 = vmatpush.msra.mxu2 %v261_v32  ;;  %v660_v62 = vld [vmem:[%s1078_s4] ss:$0 sm:$0xff] }
  0x29   :  { %351 = vmatpush.msra.mxu3 %v350_v7  ;;  %440 = vmatpush.msrb.mxu1 %v856_v54 }
  0x2a   :  { %398 = vmatpush.msrb.mxu0 %v883_v1  ;;  %264 = vmatpush.msra.mxu2 %v263_v17 }
  0x2b   :  { %357 = vmatpush.msra.mxu3 %v356_v15  ;;  %442 = vmatpush.msrb.mxu1 %v858_v55 }
  0x2c   :  { %401 = vmatpush.msrb.mxu0 %v886_v2  ;;  %471 = vmatpush.msrb.mxu2 %v276_v26 }
  0x2d   :  { %444 = vmatpush.msrb.mxu1 %v864_v58  ;;  %363 = vmatpush.msra.mxu3 %v362_v44 }
  0x2e   :  { %404 = vmatpush.msrb.mxu0 %v899_v14  ;;  %475 = vmatpush.msrb.mxu2 %v282_v27 }
  0x2f   :  { %446 = vmatpush.msrb.mxu1 %v866_v59  ;;  %369 = vmatpush.msra.mxu3 %v368_v47 }
  0x30   :  { %407 = vmatpush.msrb.mxu0 %v918_v33  ;;  %479 = vmatpush.msrb.mxu2 %v288_v37 }
  0x31   :  { %448 = vmatpush.msrb.mxu1 %v877_v63  ;;  %538 = vmatpush.msrb.mxu3 %v757_v10 }
  0x32   :  { %410 = vmatpush.msrb.mxu0 %v933_v40  ;;  %483 = vmatpush.msrb.mxu2 %v294_v38 }
  0x33   :  { %450 = vmatpush.msrb.mxu1 %v888_v6  ;;  %540 = vmatpush.msrb.mxu3 %v759_v11 }
  0x34   :  { %413 = vmatpush.msrb.mxu0 %v948_v46  ;;  %487 = vmatpush.msrb.mxu2 %v300_v8  ;;  %v617_v46 = vstv %s1080_s6  ;;  %s647_s6 = sshll.u32 %s1081_s7, 4  ;;  %s648_s6 = int_to_ptr.hbm [resolvable:$true] %s647_s6 }
  0x35   :  { %452 = vmatpush.msrb.mxu1 %v901_v22  ;;  %542 = vmatpush.msrb.mxu3 %v785_v20 }
  0x36   :  { %416 = vmatpush.msrb.mxu0 %v958_v49  ;;  %491 = vmatpush.msrb.mxu2 %v306_v9 }
  0x37   :  { %454 = vmatpush.msrb.mxu1 %v937_v41  ;;  %544 = vmatpush.msrb.mxu3 %v787_v21 }
  0x38   :  { %419 = vmatpush.msrb.mxu0 %v359_v34  ;;  %495 = vmatpush.msrb.mxu2 %v312_v12 }
  0x39   :  { %456 = vmatpush.msrb.mxu1 %v939_v42  ;;  %546 = vmatpush.msrb.mxu3 %v854_v53 }
  0x3a   :  { %422 = vmatpush.msrb.mxu0 %v365_v35  ;;  %499 = vmatpush.msrb.mxu2 %v318_v13 }
  0x3b   :  { %458 = vmatpush.msrb.mxu1 %v261_v32  ;;  %548 = vmatpush.msrb.mxu3 %v856_v54 }
  0x3c   :  { %503 = vmatpush.msrb.mxu2 %v324_v24 }
  0x3d   :  { %460 = vmatpush.msrb.mxu1 %v263_v17  ;;  %550 = vmatpush.msrb.mxu3 %v858_v55 }
  0x3e   :  { %507 = vmatpush.msrb.mxu2 %v330_v39  ;;  %v661_v39 = vld [vmem:[%s1079_s5] ss:$0 sm:$0xff]  ;;  %s692_s5 = smov [#allocation3]  }
  0x3f   :  { %552 = vmatpush.msrb.mxu3 %v864_v58  ;;  %s645_s19 = sshll.u32 %s692_s5, 4  ;;  %s646_s19 = int_to_ptr.vmem [resolvable:$true] %s645_s19 }
  0x40   :  { %511 = vmatpush.msrb.mxu2 %v336_v45 }
  0x41   :  { %554 = vmatpush.msrb.mxu3 %v866_v59 }
  0x42   :  { %515 = vmatpush.msrb.mxu2 %v342_v48 }
  0x43   :  { %556 = vmatpush.msrb.mxu3 %v877_v63 }
  0x44   :  { %519 = vmatpush.msrb.mxu2 %v348_v31 }
  0x45   :  { %558 = vmatpush.msrb.mxu3 %v888_v6 }
  0x46   :  { %523 = vmatpush.msrb.mxu2 %v354_v52 }
  0x47   :  { %560 = vmatpush.msrb.mxu3 %v901_v22 }
  0x48   :  { %527 = vmatpush.msrb.mxu2 %v360_v25 }
  0x49   :  { %562 = vmatpush.msrb.mxu3 %v937_v41 }
  0x4a   :  { %531 = vmatpush.msrb.mxu2 %v366_v43 }
  0x4b   :  { %564 = vmatpush.msrb.mxu3 %v939_v42 }
  0x4d   :  { %566 = vmatpush.msrb.mxu3 %v261_v32 }
  0x4f   :  { %568 = vmatpush.msrb.mxu3 %v263_v17 }
  0x8c   :  { %v65_v10 = vpop.f32.mrf.mxu0 }
  0x8d   :  { %v66_v19 = vadd.f32 %v659_v18, %v65_v10 }
  0x8f   :  { %v101_v11 = vpop.f32.mrf.mxu1 }
  0x90   :  { %v102_v26 = vadd.f32 %v101_v11, %v66_v19 }
  0x94   :  { %v129_v20 = vpop.f32.mrf.mxu0 }
  0x95   :  { %v130_v27 = vadd.f32 %v129_v20, %v102_v26 }
  0x97   :  { %v155_v21 = vpop.f32.mrf.mxu1 }
  0x98   :  { %v156_v28 = vadd.f32 %v155_v21, %v130_v27 }
  0x9c   :  { %v185_v29 = vpop.f32.mrf.mxu0 }
  0x9d   :  { %v186_v37 = vadd.f32 %v185_v29, %v156_v28 }
  0x9f   :  { %v209_v38 = vpop.f32.mrf.mxu1 }
  0xa0   :  { %v210_v53 = vadd.f32 %v209_v38, %v186_v37 }
  0xa2   :  { %v212_v54 = vmax.f32 %v210_v53, 0.0 }
  0xa4   :  { %v265_v55 = vand.u32 4294901760, %v212_v54 }
  0xa6   :  { %v266_v58 = vsub.f32 %v212_v54, %v265_v55  ;;  %371 = vmatmul.f32.vlgmr.msra.gmra.mxu3 %v265_v55 }
  0xa8   :  { %425 = vmatmul.f32.vlgmr.msrb.gmra.mxu0 %v266_v58  ;;  %v267_v59 = vand.u32 4294901760, %v266_v58 }
  0xaa   :  { %464 = vmatmul.f32.vlgmr.msrb.gmra.mxu1 %v267_v59  ;;  %v268_v60 = vsub.f32 %v266_v58, %v267_v59 }
  0xac   :  { %v269_v61 = vand.u32 4294901760, %v268_v60 }
  0xae   :  { %270 = vmatmul.f32.vlgmr.msra.gmra.mxu2 %v269_v61  ;;  %570 = vmatmul.f32.vlgmr.msrb.gmra.mxu3 %v265_v55 }
  0xb6   :  { %533 = vmatmul.f32.vlgmr.msrb.gmra.mxu2 %v265_v55 }
 0x125   :  { %v426_v8 = vpop.f32.mrf.mxu0 }
 0x127   :  { %v465_v12 = vpop.f32.mrf.mxu1 }
 0x129   :  { %v372_v63 = vpop.f32.mrf.mxu3 }
 0x131   :  { %v271_v1 = vpop.f32.mrf.mxu2  ;;  %v571_v24 = vpop.f32.mrf.mxu3 }
 0x132   :  { %v272_v2 = vadd.f32 %v660_v62, %v271_v1 }
 0x134   :  { %v373_v6 = vadd.f32 %v372_v63, %v272_v2 }
 0x136   :  { %v427_v9 = vadd.f32 %v426_v8, %v373_v6 }
 0x138   :  { %v466_v13 = vadd.f32 %v465_v12, %v427_v9 }
 0x139   :  { %v534_v14 = vpop.f32.mrf.mxu2 }
 0x13a   :  { %v535_v22 = vadd.f32 %v534_v14, %v466_v13 }
 0x13c   :  { %v572_v33 = vadd.f32 %v571_v24, %v535_v22 }
 0x13e   :  { %v574_v40 = vmax.f32 %v572_v33, 0.0 }
 0x140   :  { %v579_v41 = vmul.f32 %v661_v39, %v574_v40 }
 0x142   :  { %v581_v42 = vsel %vm580_vm1, %v579_v41, 0.0 }
 0x143   :  { %582 = vadd.xlane.f32.xlu0 %v581_v42 }
 0x1b6   :  { %v583_v45 = vpop.xlane.xlu0 %582 }
 0x1b7   :  { %584 = vxpose.xlu0.b32.start.end [1/1] (short) (narrow) %v583_v45, 8 }
 0x25b   :  { %v600_v48 = vpop.trf.xlu0 }
 0x25c   :  { %v618_v49 = vadd.f32 %v617_v46, %v600_v48 }
 0x25e   :  { %v656_v50 = vmul.f32 -1.442695, %v618_v49 }
 0x260   :  { %662 = vpow2.f32 %v656_v50 }
 0x266   :  { %v663_v23 = vpop.eup %662 }
 0x267   :  { %v622_v31 = vadd.f32 1.0, %v663_v23 }
 0x269   :  { %664 = vrcp.f32 %v622_v31  ;;  %v634_v56 = vand.u32 2147483648, %v622_v31  ;;  %v632_v57 = vand.u32 2147483647, %v622_v31  ;;  %vm628_vm3 = vweird.f32 %v622_v31 }
 0x26b   :  { %v635_v7 = vor.u32 1.1754944e-38, %v634_v56  ;;  %vm633_vm6 = vcmp.eq.f32.partialorder %v632_v57, 8.507059e+37 }
 0x26f   :  { %v665_v51 = vpop.eup %664 }
 0x270   :  { %v624_v4 = vmul.f32 %v665_v51, %v622_v31  ;;  %vm629_vm2 = vweird.f32 %v665_v51 }
 0x271   :  { %vm630_vm4 = vmor %vm628_vm3, %vm629_vm2 }
 0x272   :  { %v625_v52 = vsub.f32 1.0, %v624_v4 }
 0x274   :  { %v626_v5 = vmul.f32 %v665_v51, %v625_v52 }
 0x276   :  { %v627_v0 = vadd.f32 %v665_v51, %v626_v5 }
 0x278   :  { %v631_v15 = vsel %vm630_vm4, %v665_v51, %v627_v0 }
 0x279   :  { %v636_v30 = vsel %vm633_vm6, %v635_v7, %v631_v15 }
 0x27a   :  { %639 = vst.msk [vmem:[#allocation3] sm:$0x1] %vm638_vm5, %v636_v30 }
 0x27b   :  { %650 = dma.vmem_to_hbm [thread:$0]  %s646_s19, 16, %s648_s6, [#allocation4]  }
 0x27c   :  { %690 = dma.done.wait [#allocation4], 16  }
 0x27d   :  { %691 = vsyncadd [#allocation4], 4294967280 }
 0x27e   :  { %655 = vsyncpa [#allocation4], 1 }

</bundles_post_ra>
